<compile_context>
chip_gen: v5e
topology: v5e:2x2
jax: 0.10.0
libtpu: 0.0.40
codegen_flags: <defaults>
</compile_context>

<pallas_src>
import functools

import jax
import jax.numpy as jnp
from jax.experimental import pallas as pl
from jax.experimental.pallas import tpu as pltpu


def _round_up(x, m):
    return (x + m - 1) // m * m


def mlp_kernel(x_ref, w1_ref, b1_ref, w2_ref, b2_ref, o_ref):
    # Fused: y = tanh(x @ W1 + b1) @ W2 + b2, all on one VMEM-resident row tile.
    x = x_ref[...]
    h = jnp.dot(x, w1_ref[...], preferred_element_type=jnp.float32) + b1_ref[...]
    h = jnp.tanh(h)                                   # f32 EUP; kept as a value (no scratch)
    y = jnp.dot(h.astype(w2_ref.dtype), w2_ref[...],
                preferred_element_type=jnp.float32) + b2_ref[...]
    o_ref[...] = y.astype(o_ref.dtype)


def _vmem_budget_bytes():
    # ~80% of physical VMEM (v5e/v6e: 128 MiB; v7x: 64 MiB per TensorCore).
    try:
        cap = int(pltpu.get_tpu_info().vmem_capacity_bytes)
    except Exception:
        cap = 64 << 20          # conservative fallback = v7x per-TC VMEM
    return int(0.8 * cap)


@functools.partial(jax.jit, static_argnames=("tile_n",))
def mlp_forward(x, w1, b1, w2, b2, *, tile_n=2048):
    """x: [..., input_dim] -> [..., output_dim].  Weights are [in, out]."""
    lead_shape = x.shape[:-1]
    in_dim = x.shape[-1]
    hid_dim = w1.shape[-1]
    out_dim = w2.shape[-1]
    dtype = x.dtype
    itemsize = jnp.dtype(dtype).itemsize

    x2d = x.reshape((-1, in_dim))
    n = x2d.shape[0]
    b1 = b1.reshape((1, hid_dim))
    b2 = b2.reshape((1, out_dim))

    # Rows padded only to a sublane multiple (<= 7 extra rows); no feature padding,
    # no padded weight copies inside the jitted forward.
    n8 = max(8, _round_up(n, 8))
    if n8 != n:
        x2d = jnp.zeros((n8, in_dim), dtype).at[:n, :].set(x2d)

    # ---- row-tile sizing ----
    tile_n = max(8, min(_round_up(tile_n, 8), n8))
    # Keep >= 2 grid steps when there is enough work so ("parallel",) can use
    # both v7x TensorCores.
    if n8 >= 1024:
        tile_n = min(tile_n, _round_up(n8 // 2, 8))

    # VMEM footprint estimate (Mosaic pads last dim -> 128 lanes, 2nd-last -> 8 sublanes).
    in_l, hid_l, out_l = (_round_up(d, 128) for d in (in_dim, hid_dim, out_dim))

    def vmem_needed(t):
        tiles = 2 * t * (in_l + out_l) * itemsize                              # double-buffered x / y tiles
        weights = (in_l * hid_l + hid_l * out_l + hid_l + out_l) * itemsize    # single-buffered residents
        inter = t * hid_l * 4                                                  # f32 intermediate h
        return tiles + weights + inter

    budget = _vmem_budget_bytes()
    while tile_n > 8 and vmem_needed(tile_n) > budget:
        tile_n = max(8, _round_up(tile_n // 2, 8))
    # TODO(synk): if the weights alone exceed the budget (very large hidden dims),
    # add a hidden-dim grid axis marked "arbitrary" with an accumulator instead of
    # keeping both weight matrices fully VMEM-resident.

    grid = (pl.cdiv(n8, tile_n),)

    cost = pl.CostEstimate(
        flops=2 * n8 * (in_dim * hid_dim + hid_dim * out_dim),
        transcendentals=n8 * hid_dim,
        bytes_accessed=(n8 * (in_dim + out_dim)
                        + in_dim * hid_dim + hid_dim * out_dim
                        + hid_dim + out_dim) * itemsize,
    )

    vmem_limit = int(min(max(2 * vmem_needed(tile_n), 8 << 20), budget))

    # Constant-index (VMEM-resident) blocks: single-buffer to reclaim VMEM.
    resident = functools.partial(pl.BlockSpec,
                                 index_map=lambda i: (0, 0),
                                 pipeline_mode=pl.Buffered(1))

    y = pl.pallas_call(
        mlp_kernel,
        out_shape=jax.ShapeDtypeStruct((n8, out_dim), dtype),
        grid=grid,
        in_specs=[
            pl.BlockSpec((tile_n, in_dim), lambda i: (i, 0)),   # x: row-tiled, double-buffered
            resident((in_dim, hid_dim)),                        # W1
            resident((1, hid_dim)),                             # b1
            resident((hid_dim, out_dim)),                       # W2
            resident((1, out_dim)),                             # b2
        ],
        out_specs=pl.BlockSpec((tile_n, out_dim), lambda i: (i, 0)),
        compiler_params=pltpu.CompilerParams(
            dimension_semantics=("parallel",),   # shard row tiles across v7x's 2 TCs
            vmem_limit_bytes=vmem_limit,
        ),
        cost_estimate=cost,
    )(x2d, w1, b1, w2, b2)

    return y[:n].reshape(lead_shape + (out_dim,))


def init_params(key, input_dim, hidden_dim, output_dim, dtype=jnp.float32):
    """Deterministic init, mimicking nn.Linear's uniform(-1/sqrt(fan_in), +)."""
    k1, k2, k3, k4 = jax.random.split(key, 4)
    lim1 = 1.0 / (input_dim ** 0.5)
    lim2 = 1.0 / (hidden_dim ** 0.5)
    # Stored as [in, out] (transposed vs. PyTorch's [out, in]).
    w1 = jax.random.uniform(k1, (input_dim, hidden_dim), dtype, -lim1, lim1)
    b1 = jax.random.uniform(k2, (1, hidden_dim), dtype, -lim1, lim1)
    w2 = jax.random.uniform(k3, (hidden_dim, output_dim), dtype, -lim2, lim2)
    b2 = jax.random.uniform(k4, (1, output_dim), dtype, -lim2, lim2)
    return w1, b1, w2, b2


if __name__ == "__main__":
    key = jax.random.PRNGKey(0)
    k_x, k_p = jax.random.split(key)

    batch, seq = 2, 8
    input_dim, hidden_dim, output_dim = 32, 64, 16

    x = jax.random.normal(k_x, (batch, seq, input_dim), jnp.float32)
    w1, b1, w2, b2 = init_params(k_p, input_dim, hidden_dim, output_dim)

    y = mlp_forward(x, w1, b1, w2, b2)
    jax.block_until_ready(y)

    # Reference check in plain JAX (same math; dropout = identity in eval).
    ref = jnp.tanh(x @ w1 + b1[0]) @ w2 + b2[0]
    assert y.shape == (batch, seq, output_dim)
    assert jnp.allclose(y, ref, atol=1e-5, rtol=1e-5)

    print("KERNEL_OK")
</pallas_src>

<mosaic_0001>
module attributes {stable_mosaic.version = 11 : i64} {
  func.func @mlp_kernel(%arg0: i32, %arg1: memref<16x32xf32, #tpu.memory_space<vmem>>, %arg2: memref<32x64xf32, #tpu.memory_space<vmem>>, %arg3: memref<1x64xf32, #tpu.memory_space<vmem>>, %arg4: memref<64x16xf32, #tpu.memory_space<vmem>>, %arg5: memref<1x16xf32, #tpu.memory_space<vmem>>, %arg6: memref<16x16xf32, #tpu.memory_space<vmem>>) attributes {dimension_semantics = [#tpu.dimension_semantics<parallel>], iteration_bounds = array<i64: 1>, scalar_prefetch = 0 : i64, scratch_operands = 0 : i64, tpu.core_type = #tpu.core_type<tc>, window_params = [{transform_indices = @transform_0, window_bounds = array<i64: 16, 32>}, {pipeline_mode = #tpu.pipeline_mode<synchronous>, transform_indices = @transform_1, window_bounds = array<i64: 32, 64>}, {pipeline_mode = #tpu.pipeline_mode<synchronous>, transform_indices = @transform_2, window_bounds = array<i64: 1, 64>}, {pipeline_mode = #tpu.pipeline_mode<synchronous>, transform_indices = @transform_3, window_bounds = array<i64: 64, 16>}, {pipeline_mode = #tpu.pipeline_mode<synchronous>, transform_indices = @transform_4, window_bounds = array<i64: 1, 16>}, {transform_indices = @transform_5, window_bounds = array<i64: 16, 16>}]} {
    %c0 = arith.constant 0 : index
    %c0_0 = arith.constant 0 : index
    %0 = vector.load %arg1[%c0, %c0_0] : memref<16x32xf32, #tpu.memory_space<vmem>>, vector<16x32xf32>
    %c0_1 = arith.constant 0 : index
    %c0_2 = arith.constant 0 : index
    %1 = vector.load %arg2[%c0_1, %c0_2] : memref<32x64xf32, #tpu.memory_space<vmem>>, vector<32x64xf32>
    %cst = arith.constant dense<0.000000e+00> : vector<16x64xf32>
    %2 = tpu.matmul %0, %1, %cst {dimension_numbers = #tpu.dot_dimension_numbers<[1], [0], [0], [1], [0, 0, 1, 1], [], []>} : vector<16x32xf32>, vector<32x64xf32>, vector<16x64xf32> -> vector<16x64xf32>
    %c0_3 = arith.constant 0 : index
    %c0_4 = arith.constant 0 : index
    %3 = vector.load %arg3[%c0_3, %c0_4] : memref<1x64xf32, #tpu.memory_space<vmem>>, vector<1x64xf32>
    %4 = vector.broadcast %3 : vector<1x64xf32> to vector<16x64xf32>
    %5 = arith.addf %2, %4 : vector<16x64xf32>
    %6 = math.tanh %5 : vector<16x64xf32>
    %c0_5 = arith.constant 0 : index
    %c0_6 = arith.constant 0 : index
    %7 = vector.load %arg4[%c0_5, %c0_6] : memref<64x16xf32, #tpu.memory_space<vmem>>, vector<64x16xf32>
    %cst_7 = arith.constant dense<0.000000e+00> : vector<16x16xf32>
    %8 = tpu.matmul %6, %7, %cst_7 {dimension_numbers = #tpu.dot_dimension_numbers<[1], [0], [0], [1], [0, 0, 1, 1], [], []>} : vector<16x64xf32>, vector<64x16xf32>, vector<16x16xf32> -> vector<16x16xf32>
    %c0_8 = arith.constant 0 : index
    %c0_9 = arith.constant 0 : index
    %9 = vector.load %arg5[%c0_8, %c0_9] : memref<1x16xf32, #tpu.memory_space<vmem>>, vector<1x16xf32>
    %10 = vector.broadcast %9 : vector<1x16xf32> to vector<16x16xf32>
    %11 = arith.addf %8, %10 : vector<16x16xf32>
    %c0_10 = arith.constant 0 : index
    %c0_11 = arith.constant 0 : index
    %12 = vector.load %arg6[%c0_10, %c0_11] : memref<16x16xf32, #tpu.memory_space<vmem>>, vector<16x16xf32>
    tpu.vector_store %arg6[%c0_10, %c0_11], %11 {strides = array<i32>} : memref<16x16xf32, #tpu.memory_space<vmem>>, vector<16x16xf32>,
    return
  }
  func.func @transform_0(%arg0: i32) -> (i32, i32) {
    %c0_i32 = arith.constant 0 : i32
    %c0_i32_0 = arith.constant 0 : i32
    return %arg0, %c0_i32 : i32, i32
  }
  func.func @transform_1(%arg0: i32) -> (i32, i32) {
    %c0_i32 = arith.constant 0 : i32
    %c0_i32_0 = arith.constant 0 : i32
    %c0_i32_1 = arith.constant 0 : i32
    return %c0_i32, %c0_i32_0 : i32, i32
  }
  func.func @transform_2(%arg0: i32) -> (i32, i32) {
    %c0_i32 = arith.constant 0 : i32
    %c0_i32_0 = arith.constant 0 : i32
    %c0_i32_1 = arith.constant 0 : i32
    return %c0_i32, %c0_i32_0 : i32, i32
  }
  func.func @transform_3(%arg0: i32) -> (i32, i32) {
    %c0_i32 = arith.constant 0 : i32
    %c0_i32_0 = arith.constant 0 : i32
    %c0_i32_1 = arith.constant 0 : i32
    return %c0_i32, %c0_i32_0 : i32, i32
  }
  func.func @transform_4(%arg0: i32) -> (i32, i32) {
    %c0_i32 = arith.constant 0 : i32
    %c0_i32_0 = arith.constant 0 : i32
    %c0_i32_1 = arith.constant 0 : i32
    return %c0_i32, %c0_i32_0 : i32, i32
  }
  func.func @transform_5(%arg0: i32) -> (i32, i32) {
    %c0_i32 = arith.constant 0 : i32
    %c0_i32_0 = arith.constant 0 : i32
    return %arg0, %c0_i32 : i32, i32
  }
}

</mosaic_0001>

<bundles_post_ra>
// kernel: mlp_forward.1
= control target key start
LH: loop header
LB: loop body
LE: loop exit
PB: predicated region body
PF: predicated region fallthrough
CT: control target
= control target key end

     0   :  { %s261_s0 = inlined_call_operand.vmem [shape: f32[16,32], index: 0, kind: input, shape index: {}]   ;;  %s262_s1 = inlined_call_operand.vmem [shape: f32[32,64], index: 1, kind: input, shape index: {}]   ;;  %s263_s2 = inlined_call_operand.vmem [shape: f32[1,64], index: 2, kind: input, shape index: {}]   ;;  %s264_s3 = inlined_call_operand.vmem [shape: f32[64,16], index: 3, kind: input, shape index: {}]   ;;  %s265_s4 = inlined_call_operand.vmem [shape: f32[1,16], index: 4, kind: input, shape index: {}]   ;;  %s266_s5 = inlined_call_operand.hbm [shape: f32[16,16], index: 5, kind: output, shape index: {}]  }
   0x1   :  { %v26_v0 = vld [vmem:[%s262_s1 + $0x18] sm:$0xff]  ;;  %v25_v1 = vld [vmem:[%s262_s1 + $0x10] sm:$0xff]  ;;  %v24_v2 = vld [vmem:[%s262_s1 + $0x8] sm:$0xff] }
   0x2   :  { %130 = vmatpush.msra.mxu3 %v26_v0  ;;  %50 = vmatpush.msra.mxu0 %v26_v0  ;;  %v70_v3 = vld [vmem:[%s264_s3 + $0x38] sm:$0xff]  ;;  %v69_v4 = vld [vmem:[%s264_s3 + $0x30] sm:$0xff]  ;;  %v23_v5 = vld [vmem:[%s262_s1] sm:$0xff] }
   0x3   :  { %134 = vmatpush.msra.mxu2 %v70_v3  ;;  %90 = vmatpush.msra.mxu1 %v70_v3 }
   0x4   :  { %131 = vmatpush.msra.mxu3 %v25_v1  ;;  %51 = vmatpush.msra.mxu0 %v25_v1 }
   0x5   :  { %10 = vsyncpa [#allocation3], 0  ;;  %v22_v6 = vld [vmem:[%s261_s0 + $0x8] sm:$0xff]  ;;  %vm31_vm0 = vcmask 261120   ;;  %v21_v7 = vld [vmem:[%s261_s0] sm:$0xff]  ;;  %135 = vmatpush.msra.mxu2 %v69_v4  ;;  %91 = vmatpush.msra.mxu1 %v69_v4  ;;  %vm75_vm1 = vcmask 523264  }
   0x6   :  { %132 = vmatpush.msra.mxu3 %v24_v2  ;;  %52 = vmatpush.msra.mxu0 %v24_v2  ;;  %v68_v8 = vld [vmem:[%s264_s3 + $0x28] sm:$0xff]  ;;  %v67_v9 = vld [vmem:[%s264_s3 + $0x20] sm:$0xff]  ;;  %v66_v10 = vld [vmem:[%s264_s3 + $0x18] sm:$0xff]  ;;  %vm105_vm2 = vcmask 130048   ;;  %s114_s25 = sshll.u32 %s266_s5, 4  ;;  %s178_s26 = smov 128   ;;  %s115_s25 = int_to_ptr.hbm [resolvable:$true] %s114_s25 }
   0x7   :  { %136 = vmatpush.msra.mxu2 %v68_v8  ;;  %92 = vmatpush.msra.mxu1 %v68_v8  ;;  %v65_v11 = vld [vmem:[%s264_s3 + $0x10] sm:$0xff]  ;;  %v64_v12 = vld [vmem:[%s264_s3 + $0x8] sm:$0xff]  ;;  %v63_v13 = vld [vmem:[%s264_s3] sm:$0xff]  ;;  %s179_s27 = smov 8  }
   0x8   :  { %133 = vmatpush.msra.mxu3 %v23_v5  ;;  %53 = vmatpush.msra.mxu0 %v23_v5  ;;  %v145_v14 = vld [vmem:[%s263_s2] ss:$0 sm:$0xff]  ;;  %s177_s2 = smov [#allocation2]  }
   0x9   :  { %127 = vmatmul.msk.f32.vlgmr.msra.gmra.mxu3 %vm31_vm0, %v22_v6  ;;  %126 = vmatmul.msk.f32.vlgmr.msra.gmra.mxu0 %vm31_vm0, %v21_v7  ;;  %v146_v21 = vld [vmem:[%s265_s4] ss:$0 sm:$0xff]  ;;  %s112_s22 = sshll.u32 %s177_s2, 4  ;;  %s113_s22 = int_to_ptr.vmem [resolvable:$true] %s112_s22 }
   0xa   :  { %137 = vmatpush.msra.mxu2 %v67_v9  ;;  %93 = vmatpush.msra.mxu1 %v67_v9 }
   0xc   :  { %138 = vmatpush.msra.mxu2 %v66_v10  ;;  %94 = vmatpush.msra.mxu1 %v66_v10 }
   0xe   :  { %139 = vmatpush.msra.mxu2 %v65_v11  ;;  %95 = vmatpush.msra.mxu1 %v65_v11 }
  0x10   :  { %140 = vmatpush.msra.mxu2 %v64_v12  ;;  %96 = vmatpush.msra.mxu1 %v64_v12 }
  0x12   :  { %141 = vmatpush.msra.mxu2 %v63_v13  ;;  %97 = vmatpush.msra.mxu1 %v63_v13 }
  0x86   :  { %v55_v15 = vpop.f32.mrf.mxu0 }
  0x87   :  { %v56_v16 = vadd.f32 %v145_v14, %v55_v15 }
  0x89   :  { %147 = vtanh.f32 %v56_v16 }
  0x8c   :  { %v58_v17 = vpop.f32.mrf.mxu3 }
  0x8d   :  { %v59_v18 = vadd.f32 %v145_v14, %v58_v17 }
  0x8f   :  { %v148_v19 = vpop.eup %147  ;;  %149 = vtanh.f32 %v59_v18 }
  0x90   :  { %128 = vmatmul.msk.f32.vlgmr.msra.gmra.mxu1 %vm75_vm1, %v148_v19 }
  0x95   :  { %v150_v20 = vpop.eup %149 }
  0x96   :  { %129 = vmatmul.msk.f32.vlgmr.msra.gmra.mxu2 %vm75_vm1, %v150_v20 }
 0x10d   :  { %v99_v22 = vpop.f32.mrf.mxu1 }
 0x10e   :  { %v100_v23 = vadd.f32 %v146_v21, %v99_v22 }
 0x110   :  { %106 = vst.msk [vmem:[#allocation2] sm:$0xff] %vm105_vm2, %v100_v23 }
 0x119   :  { %v102_v24 = vpop.f32.mrf.mxu2 }
 0x11a   :  { %v103_v25 = vadd.f32 %v146_v21, %v102_v24 }
 0x11c   :  { %107 = vst.msk [vmem:[#allocation2 + $0x8] sm:$0xff] %vm105_vm2, %v103_v25 }
 0x11d   :  { %120 = dma.vmem_to_hbm [thread:$0]  %s113_s22, 256, %s115_s25, [#allocation3], %s178_s26, %s178_s26, %s179_s27  }
 0x11e   :  { %175 = dma.done.wait [#allocation3], 256  }
 0x11f   :  { %176 = vsyncadd [#allocation3], 4294967040 }
 0x120   :  { %125 = vsyncpa [#allocation3], 1 }

</bundles_post_ra>
